<compile_context>
chip_gen: v7x
topology: tpu7x:2x2x1
jax: 0.10.0
libtpu: 0.0.40
codegen_flags: <defaults>
</compile_context>

<pallas_src>
import jax
import jax.numpy as jnp
import numpy as np
from jax import lax
from jax.experimental import pallas as pl
from jax.experimental.pallas import tpu as pltpu

LANES = 128
MAX_BLOCK_ROWS = 1024          # (1024, 128) f32 = 512 KiB per plane per buffer

# class weights from the module __init__ (deterministic, no checkpoint)
W_F = (0.01, 1.0)              # nn.CrossEntropyLoss(weight=[0.01, 1])
W_B = (1.0, 0.01)              # nn.CrossEntropyLoss(weight=[1, 0.01])


def _make_kernel(R, HW, nj, needs_mask):
    """R: pixel-block rows; HW: valid pixels per batch; nj: pixel blocks."""
    pix_per_block = R * LANES

    def kernel(p_ref, t_ref, b_ref, f_ref, o_ref, acc_ref):
        j = pl.program_id(1)

        @pl.when(j == 0)
        def _():
            acc_ref[...] = jnp.zeros_like(acc_ref)

        p = p_ref[0].astype(jnp.float32)        # (R, 128) probabilities
        t1 = t_ref[0] > 0                       # (R, 128) bool: class-1 pixels
        tf = t1.astype(jnp.float32)

        if needs_mask:
            row = lax.broadcasted_iota(jnp.int32, (R, LANES), 0)
            lane = lax.broadcasted_iota(jnp.int32, (R, LANES), 1)
            idx = j * pix_per_block + row * LANES + lane
            valid = idx < HW                    # static tail mask, no HBM stream

            def msk(x):
                return jnp.where(valid, x, 0.0)
        else:
            def msk(x):
                return x

        # --- BCE:  -(t log p + (1-t) log(1-p)); select first -> one log.
        #     PyTorch BCELoss clamps log terms at -100.
        sel = jnp.where(t1, p, 1.0 - p)
        bce = -jnp.maximum(jnp.log(sel), -100.0)

        # --- weighted 2-class CE:  nll = lse - x_true = softplus(x_other - x_true)
        def head(xc, w0, w1):
            x0 = xc[0].astype(jnp.float32)      # channel 0 logits (R, 128)
            x1 = xc[1].astype(jnp.float32)      # channel 1 logits (R, 128)
            d = x1 - x0
            z = jnp.where(t1, -d, d)            # other - true logit
            nll = jnp.maximum(z, 0.0) + jnp.log1p(jnp.exp(-jnp.abs(d)))
            w = jnp.where(t1, w1, w0)
            return w * nll

        fnum = head(f_ref[0], W_F[0], W_F[1])
        bnum = head(b_ref[0], W_B[0], W_B[1])

        acc_ref[0] += msk(bce)
        acc_ref[1] += msk(fnum)
        acc_ref[2] += msk(bnum)
        acc_ref[3] += msk(tf)                   # class-1 count -> CE denominators

        @pl.when(j == nj - 1)
        def _():
            # one deferred reduction per batch element: (4, R, 128) -> (1, 4, 128)
            o_ref[...] = jnp.sum(acc_ref[...], axis=1)[None]

    return kernel


def _pad_last_to(x, size):
    pad = size - x.shape[-1]
    if pad == 0:
        return x
    return jnp.pad(x, [(0, 0)] * (x.ndim - 1) + [(0, pad)])


@jax.jit
def tri_loss(out, out_b, out_f, target):
    """out: (N,1,H,W) probs; out_b, out_f: (N,2,H,W) logits; target: (N,H,W) ints."""
    N = out.shape[0]
    H, W = out.shape[2], out.shape[3]
    HW = H * W
    M = N * HW

    rows = -(-HW // LANES)                    # ceil-div
    HW_pad = rows * LANES
    R = rows if rows <= MAX_BLOCK_ROWS else MAX_BLOCK_ROWS
    nj = -(-rows // R)
    needs_mask = (nj * R * LANES) != HW       # padded or OOB tail pixels exist

    # Free reshapes when HW % 128 == 0; otherwise one pad copy per tensor.
    p = _pad_last_to(out.astype(jnp.float32).reshape(N, HW), HW_pad)
    p = p.reshape(N, rows, LANES)
    t = _pad_last_to(target.astype(jnp.int32).reshape(N, HW), HW_pad)
    t = t.reshape(N, rows, LANES)
    b = _pad_last_to(out_b.astype(jnp.float32).reshape(N, 2, HW), HW_pad)
    b = b.reshape(N, 2, rows, LANES)
    f = _pad_last_to(out_f.astype(jnp.float32).reshape(N, 2, HW), HW_pad)
    f = f.reshape(N, 2, rows, LANES)

    acc = pl.pallas_call(
        _make_kernel(R, HW, nj, needs_mask),
        out_shape=jax.ShapeDtypeStruct((N, 4, LANES), jnp.float32),
        grid=(N, nj),
        in_specs=[
            pl.BlockSpec((1, R, LANES), lambda n, j: (n, j, 0)),          # p
            pl.BlockSpec((1, R, LANES), lambda n, j: (n, j, 0)),          # target
            pl.BlockSpec((1, 2, R, LANES), lambda n, j: (n, 0, j, 0)),    # out_b
            pl.BlockSpec((1, 2, R, LANES), lambda n, j: (n, 0, j, 0)),    # out_f
        ],
        out_specs=pl.BlockSpec((1, 4, LANES), lambda n, j: (n, 0, 0)),
        scratch_shapes=[pltpu.VMEM((4, R, LANES), jnp.float32)],
        compiler_params=pltpu.CompilerParams(
            dimension_semantics=("parallel", "arbitrary"),
            vmem_limit_bytes=32 * 1024 * 1024,
        ),
    )(p, t, b, f)

    sums = jnp.sum(acc, axis=(0, 2))          # (4,): bce_sum, f_num, b_num, n1
    bce_sum, f_num, b_num, n1 = sums[0], sums[1], sums[2], sums[3]
    n0 = jnp.float32(M) - n1
    f_den = W_F[0] * n0 + W_F[1] * n1
    b_den = W_B[0] * n0 + W_B[1] * n1
    losses1 = bce_sum / jnp.float32(M)
    return losses1 + 0.3 * (b_num / b_den) + 0.7 * (f_num / f_den)


def tri_loss_ref(out, out_b, out_f, target):
    """Plain-JAX reference mirroring the PyTorch TriLoss module."""
    p = out[:, 0]
    t = target.astype(jnp.float32)
    bce = -(t * jnp.maximum(jnp.log(p), -100.0)
            + (1.0 - t) * jnp.maximum(jnp.log(1.0 - p), -100.0))
    losses1 = bce.mean()

    def weighted_ce(logits, w):
        logp = jax.nn.log_softmax(logits, axis=1)
        oh = jax.nn.one_hot(target, 2, axis=1, dtype=jnp.float32)
        nll = -jnp.sum(oh * logp, axis=1)
        wt = w[target]
        return jnp.sum(wt * nll) / jnp.sum(wt)

    lf = weighted_ce(out_f, jnp.array(W_F, jnp.float32))
    lb = weighted_ce(out_b, jnp.array(W_B, jnp.float32))
    return losses1 + 0.3 * lb + 0.7 * lf


if __name__ == "__main__":
    key = jax.random.PRNGKey(0)
    key_a, key_b = jax.random.split(key)

    def check(N, H, W, k):
        k1, k2, k3, k4 = jax.random.split(k, 4)
        out = jax.nn.sigmoid(jax.random.normal(k1, (N, 1, H, W), jnp.float32))
        out_b = jax.random.normal(k2, (N, 2, H, W), jnp.float32)
        out_f = jax.random.normal(k3, (N, 2, H, W), jnp.float32)
        target = jax.random.randint(k4, (N, H, W), 0, 2, jnp.int32)

        loss = jax.block_until_ready(tri_loss(out, out_b, out_f, target))
        ref = tri_loss_ref(out, out_b, out_f, target)
        np.testing.assert_allclose(np.asarray(loss), np.asarray(ref),
                                   rtol=1e-4, atol=1e-5)

    check(2, 16, 16, key_a)    # aligned fast path: zero host-side copies
    check(2, 15, 15, key_b)    # unaligned path: pad + static in-kernel tail mask
    print("KERNEL_OK")
</pallas_src>

<mosaic_0001>
module attributes {stable_mosaic.version = 11 : i64} {
  func.func @kernel(%arg0: i32, %arg1: i32, %arg2: memref<1x2x128xf32, #tpu.memory_space<vmem>>, %arg3: memref<1x2x128xi32, #tpu.memory_space<vmem>>, %arg4: memref<1x2x2x128xf32, #tpu.memory_space<vmem>>, %arg5: memref<1x2x2x128xf32, #tpu.memory_space<vmem>>, %arg6: memref<1x4x128xf32, #tpu.memory_space<vmem>>, %arg7: memref<4x2x128xf32, #tpu.memory_space<vmem>>) attributes {dimension_semantics = [#tpu.dimension_semantics<parallel>, #tpu.dimension_semantics<arbitrary>], iteration_bounds = array<i64: 2, 1>, scalar_prefetch = 0 : i64, scratch_operands = 1 : i64, tpu.core_type = #tpu.core_type<tc>, window_params = [{transform_indices = @transform_0, window_bounds = array<i64: 1, 2, 128>}, {transform_indices = @transform_1, window_bounds = array<i64: 1, 2, 128>}, {transform_indices = @transform_2, window_bounds = array<i64: 1, 2, 2, 128>}, {transform_indices = @transform_3, window_bounds = array<i64: 1, 2, 2, 128>}, {transform_indices = @transform_4, window_bounds = array<i64: 1, 4, 128>}]} {
    %c0_i32 = arith.constant 0 : i32
    %0 = arith.cmpi eq, %arg1, %c0_i32 : i32
    %1 = arith.extui %0 : i1 to i32
    %c0_i32_0 = arith.constant 0 : i32
    %2 = arith.cmpi ne, %1, %c0_i32_0 : i32
    scf.if %2 {
      %cst_50 = arith.constant 0.000000e+00 : f32
      %90 = vector.broadcast %cst_50 : f32 to vector<4x2x128xf32>
      %c0_51 = arith.constant 0 : index
      %c0_52 = arith.constant 0 : index
      %c0_53 = arith.constant 0 : index
      %91 = vector.load %arg7[%c0_51, %c0_52, %c0_53] : memref<4x2x128xf32, #tpu.memory_space<vmem>>, vector<4x2x128xf32>
      tpu.vector_store %arg7[%c0_51, %c0_52, %c0_53], %90 {strides = array<i32>} : memref<4x2x128xf32, #tpu.memory_space<vmem>>, vector<4x2x128xf32>,
    } else {
    }
    %c0 = arith.constant 0 : index
    %c0_1 = arith.constant 0 : index
    %c0_2 = arith.constant 0 : index
    %3 = vector.load %arg2[%c0, %c0_1, %c0_2] : memref<1x2x128xf32, #tpu.memory_space<vmem>>, vector<1x2x128xf32>
    %4 = vector.shape_cast %3 : vector<1x2x128xf32> to vector<2x128xf32>
    %c0_3 = arith.constant 0 : index
    %c0_4 = arith.constant 0 : index
    %c0_5 = arith.constant 0 : index
    %5 = vector.load %arg3[%c0_3, %c0_4, %c0_5] : memref<1x2x128xi32, #tpu.memory_space<vmem>>, vector<1x2x128xi32>
    %6 = vector.shape_cast %5 : vector<1x2x128xi32> to vector<2x128xi32>
    %c0_i32_6 = arith.constant 0 : i32
    %7 = vector.broadcast %c0_i32_6 : i32 to vector<2x128xi32>
    %8 = arith.cmpi sgt, %6, %7 : vector<2x128xi32>
    %9 = arith.extui %8 : vector<2x128xi1> to vector<2x128xi32>
    %10 = arith.sitofp %9 : vector<2x128xi32> to vector<2x128xf32>
    %cst = arith.constant 1.000000e+00 : f32
    %11 = vector.broadcast %cst : f32 to vector<2x128xf32>
    %12 = arith.subf %11, %4 : vector<2x128xf32>
    %13 = arith.select %8, %4, %12 : vector<2x128xi1>, vector<2x128xf32>
    %14 = math.log %13 : vector<2x128xf32>
    %cst_7 = arith.constant -1.000000e+02 : f32
    %15 = vector.broadcast %cst_7 : f32 to vector<2x128xf32>
    %16 = arith.maximumf %14, %15 : vector<2x128xf32>
    %cst_8 = arith.constant 0.000000e+00 : f32
    %17 = vector.broadcast %cst_8 : f32 to vector<2x128xf32>
    %18 = arith.subf %17, %16 : vector<2x128xf32>
    %c0_9 = arith.constant 0 : index
    %c0_10 = arith.constant 0 : index
    %c0_11 = arith.constant 0 : index
    %c0_12 = arith.constant 0 : index
    %19 = vector.load %arg5[%c0_9, %c0_10, %c0_11, %c0_12] : memref<1x2x2x128xf32, #tpu.memory_space<vmem>>, vector<1x2x2x128xf32>
    %20 = vector.shape_cast %19 : vector<1x2x2x128xf32> to vector<2x2x128xf32>
    %21 = vector.extract_strided_slice %20 {offsets = [0, 0, 0], sizes = [1, 2, 128], strides = [1, 1, 1]} : vector<2x2x128xf32> to vector<1x2x128xf32>
    %22 = vector.shape_cast %21 : vector<1x2x128xf32> to vector<2x128xf32>
    %23 = vector.extract_strided_slice %20 {offsets = [1, 0, 0], sizes = [1, 2, 128], strides = [1, 1, 1]} : vector<2x2x128xf32> to vector<1x2x128xf32>
    %24 = vector.shape_cast %23 : vector<1x2x128xf32> to vector<2x128xf32>
    %25 = arith.subf %24, %22 : vector<2x128xf32>
    %cst_13 = arith.constant 0.000000e+00 : f32
    %26 = vector.broadcast %cst_13 : f32 to vector<2x128xf32>
    %27 = arith.subf %26, %25 : vector<2x128xf32>
    %28 = arith.select %8, %27, %25 : vector<2x128xi1>, vector<2x128xf32>
    %cst_14 = arith.constant 0.000000e+00 : f32
    %29 = vector.broadcast %cst_14 : f32 to vector<2x128xf32>
    %30 = arith.maximumf %28, %29 : vector<2x128xf32>
    %31 = math.absf %25 : vector<2x128xf32>
    %cst_15 = arith.constant 0.000000e+00 : f32
    %32 = vector.broadcast %cst_15 : f32 to vector<2x128xf32>
    %33 = arith.subf %32, %31 : vector<2x128xf32>
    %34 = math.exp %33 : vector<2x128xf32>
    %35 = math.log1p %34 : vector<2x128xf32>
    %36 = arith.addf %30, %35 : vector<2x128xf32>
    %cst_16 = arith.constant 1.000000e+00 : f32
    %cst_17 = arith.constant 0.00999999977 : f32
    %37 = vector.broadcast %cst_16 : f32 to vector<2x128xf32>
    %38 = vector.broadcast %cst_17 : f32 to vector<2x128xf32>
    %39 = arith.select %8, %37, %38 : vector<2x128xi1>, vector<2x128xf32>
    %40 = arith.mulf %39, %36 : vector<2x128xf32>
    %c0_18 = arith.constant 0 : index
    %c0_19 = arith.constant 0 : index
    %c0_20 = arith.constant 0 : index
    %c0_21 = arith.constant 0 : index
    %41 = vector.load %arg4[%c0_18, %c0_19, %c0_20, %c0_21] : memref<1x2x2x128xf32, #tpu.memory_space<vmem>>, vector<1x2x2x128xf32>
    %42 = vector.shape_cast %41 : vector<1x2x2x128xf32> to vector<2x2x128xf32>
    %43 = vector.extract_strided_slice %42 {offsets = [0, 0, 0], sizes = [1, 2, 128], strides = [1, 1, 1]} : vector<2x2x128xf32> to vector<1x2x128xf32>
    %44 = vector.shape_cast %43 : vector<1x2x128xf32> to vector<2x128xf32>
    %45 = vector.extract_strided_slice %42 {offsets = [1, 0, 0], sizes = [1, 2, 128], strides = [1, 1, 1]} : vector<2x2x128xf32> to vector<1x2x128xf32>
    %46 = vector.shape_cast %45 : vector<1x2x128xf32> to vector<2x128xf32>
    %47 = arith.subf %46, %44 : vector<2x128xf32>
    %cst_22 = arith.constant 0.000000e+00 : f32
    %48 = vector.broadcast %cst_22 : f32 to vector<2x128xf32>
    %49 = arith.subf %48, %47 : vector<2x128xf32>
    %50 = arith.select %8, %49, %47 : vector<2x128xi1>, vector<2x128xf32>
    %cst_23 = arith.constant 0.000000e+00 : f32
    %51 = vector.broadcast %cst_23 : f32 to vector<2x128xf32>
    %52 = arith.maximumf %50, %51 : vector<2x128xf32>
    %53 = math.absf %47 : vector<2x128xf32>
    %cst_24 = arith.constant 0.000000e+00 : f32
    %54 = vector.broadcast %cst_24 : f32 to vector<2x128xf32>
    %55 = arith.subf %54, %53 : vector<2x128xf32>
    %56 = math.exp %55 : vector<2x128xf32>
    %57 = math.log1p %56 : vector<2x128xf32>
    %58 = arith.addf %52, %57 : vector<2x128xf32>
    %cst_25 = arith.constant 0.00999999977 : f32
    %cst_26 = arith.constant 1.000000e+00 : f32
    %59 = vector.broadcast %cst_25 : f32 to vector<2x128xf32>
    %60 = vector.broadcast %cst_26 : f32 to vector<2x128xf32>
    %61 = arith.select %8, %59, %60 : vector<2x128xi1>, vector<2x128xf32>
    %62 = arith.mulf %61, %58 : vector<2x128xf32>
    %c0_27 = arith.constant 0 : index
    %c0_28 = arith.constant 0 : index
    %c0_29 = arith.constant 0 : index
    %63 = vector.load %arg7[%c0_27, %c0_28, %c0_29] : memref<4x2x128xf32, #tpu.memory_space<vmem>>, vector<1x2x128xf32>
    %64 = vector.shape_cast %63 : vector<1x2x128xf32> to vector<2x128xf32>
    %65 = arith.addf %64, %18 : vector<2x128xf32>
    %c0_30 = arith.constant 0 : index
    %c0_31 = arith.constant 0 : index
    %c0_32 = arith.constant 0 : index
    %66 = vector.load %arg7[%c0_30, %c0_31, %c0_32] : memref<4x2x128xf32, #tpu.memory_space<vmem>>, vector<1x2x128xf32>
    %67 = vector.shape_cast %66 : vector<1x2x128xf32> to vector<2x128xf32>
    %68 = vector.shape_cast %65 : vector<2x128xf32> to vector<1x2x128xf32>
    tpu.vector_store %arg7[%c0_30, %c0_31, %c0_32], %68 {strides = array<i32>} : memref<4x2x128xf32, #tpu.memory_space<vmem>>, vector<1x2x128xf32>,
    %c1 = arith.constant 1 : index
    %c0_33 = arith.constant 0 : index
    %c0_34 = arith.constant 0 : index
    %69 = vector.load %arg7[%c1, %c0_33, %c0_34] : memref<4x2x128xf32, #tpu.memory_space<vmem>>, vector<1x2x128xf32>
    %70 = vector.shape_cast %69 : vector<1x2x128xf32> to vector<2x128xf32>
    %71 = arith.addf %70, %40 : vector<2x128xf32>
    %c1_35 = arith.constant 1 : index
    %c0_36 = arith.constant 0 : index
    %c0_37 = arith.constant 0 : index
    %72 = vector.load %arg7[%c1_35, %c0_36, %c0_37] : memref<4x2x128xf32, #tpu.memory_space<vmem>>, vector<1x2x128xf32>
    %73 = vector.shape_cast %72 : vector<1x2x128xf32> to vector<2x128xf32>
    %74 = vector.shape_cast %71 : vector<2x128xf32> to vector<1x2x128xf32>
    tpu.vector_store %arg7[%c1_35, %c0_36, %c0_37], %74 {strides = array<i32>} : memref<4x2x128xf32, #tpu.memory_space<vmem>>, vector<1x2x128xf32>,
    %c2 = arith.constant 2 : index
    %c0_38 = arith.constant 0 : index
    %c0_39 = arith.constant 0 : index
    %75 = vector.load %arg7[%c2, %c0_38, %c0_39] : memref<4x2x128xf32, #tpu.memory_space<vmem>>, vector<1x2x128xf32>
    %76 = vector.shape_cast %75 : vector<1x2x128xf32> to vector<2x128xf32>
    %77 = arith.addf %76, %62 : vector<2x128xf32>
    %c2_40 = arith.constant 2 : index
    %c0_41 = arith.constant 0 : index
    %c0_42 = arith.constant 0 : index
    %78 = vector.load %arg7[%c2_40, %c0_41, %c0_42] : memref<4x2x128xf32, #tpu.memory_space<vmem>>, vector<1x2x128xf32>
    %79 = vector.shape_cast %78 : vector<1x2x128xf32> to vector<2x128xf32>
    %80 = vector.shape_cast %77 : vector<2x128xf32> to vector<1x2x128xf32>
    tpu.vector_store %arg7[%c2_40, %c0_41, %c0_42], %80 {strides = array<i32>} : memref<4x2x128xf32, #tpu.memory_space<vmem>>, vector<1x2x128xf32>,
    %c3 = arith.constant 3 : index
    %c0_43 = arith.constant 0 : index
    %c0_44 = arith.constant 0 : index
    %81 = vector.load %arg7[%c3, %c0_43, %c0_44] : memref<4x2x128xf32, #tpu.memory_space<vmem>>, vector<1x2x128xf32>
    %82 = vector.shape_cast %81 : vector<1x2x128xf32> to vector<2x128xf32>
    %83 = arith.addf %82, %10 : vector<2x128xf32>
    %c3_45 = arith.constant 3 : index
    %c0_46 = arith.constant 0 : index
    %c0_47 = arith.constant 0 : index
    %84 = vector.load %arg7[%c3_45, %c0_46, %c0_47] : memref<4x2x128xf32, #tpu.memory_space<vmem>>, vector<1x2x128xf32>
    %85 = vector.shape_cast %84 : vector<1x2x128xf32> to vector<2x128xf32>
    %86 = vector.shape_cast %83 : vector<2x128xf32> to vector<1x2x128xf32>
    tpu.vector_store %arg7[%c3_45, %c0_46, %c0_47], %86 {strides = array<i32>} : memref<4x2x128xf32, #tpu.memory_space<vmem>>, vector<1x2x128xf32>,
    %c0_i32_48 = arith.constant 0 : i32
    %87 = arith.cmpi eq, %arg1, %c0_i32_48 : i32
    %88 = arith.extui %87 : i1 to i32
    %c0_i32_49 = arith.constant 0 : i32
    %89 = arith.cmpi ne, %88, %c0_i32_49 : i32
    scf.if %89 {
      %c0_50 = arith.constant 0 : index
      %c0_51 = arith.constant 0 : index
      %c0_52 = arith.constant 0 : index
      %90 = vector.load %arg7[%c0_50, %c0_51, %c0_52] : memref<4x2x128xf32, #tpu.memory_space<vmem>>, vector<4x2x128xf32>
      %cst_53 = arith.constant dense<0.000000e+00> : vector<4x128xf32>
      %91 = vector.multi_reduction <add>, %90, %cst_53 [1] : vector<4x2x128xf32> to vector<4x128xf32>
      %92 = vector.shape_cast %91 : vector<4x128xf32> to vector<1x4x128xf32>
      %c0_54 = arith.constant 0 : index
      %c0_55 = arith.constant 0 : index
      %c0_56 = arith.constant 0 : index
      %93 = vector.load %arg6[%c0_54, %c0_55, %c0_56] : memref<1x4x128xf32, #tpu.memory_space<vmem>>, vector<1x4x128xf32>
      tpu.vector_store %arg6[%c0_54, %c0_55, %c0_56], %92 {strides = array<i32>} : memref<1x4x128xf32, #tpu.memory_space<vmem>>, vector<1x4x128xf32>,
    } else {
    }
    return
  }
  func.func @transform_0(%arg0: i32, %arg1: i32) -> (i32, i32, i32) {
    %c0_i32 = arith.constant 0 : i32
    %c0_i32_0 = arith.constant 0 : i32
    return %arg0, %arg1, %c0_i32 : i32, i32, i32
  }
  func.func @transform_1(%arg0: i32, %arg1: i32) -> (i32, i32, i32) {
    %c0_i32 = arith.constant 0 : i32
    %c0_i32_0 = arith.constant 0 : i32
    return %arg0, %arg1, %c0_i32 : i32, i32, i32
  }
  func.func @transform_2(%arg0: i32, %arg1: i32) -> (i32, i32, i32, i32) {
    %c0_i32 = arith.constant 0 : i32
    %c0_i32_0 = arith.constant 0 : i32
    %c0_i32_1 = arith.constant 0 : i32
    return %arg0, %c0_i32, %arg1, %c0_i32_0 : i32, i32, i32, i32
  }
  func.func @transform_3(%arg0: i32, %arg1: i32) -> (i32, i32, i32, i32) {
    %c0_i32 = arith.constant 0 : i32
    %c0_i32_0 = arith.constant 0 : i32
    %c0_i32_1 = arith.constant 0 : i32
    return %arg0, %c0_i32, %arg1, %c0_i32_0 : i32, i32, i32, i32
  }
  func.func @transform_4(%arg0: i32, %arg1: i32) -> (i32, i32, i32) {
    %c0_i32 = arith.constant 0 : i32
    %c0_i32_0 = arith.constant 0 : i32
    %c0_i32_1 = arith.constant 0 : i32
    return %arg0, %c0_i32, %c0_i32_0 : i32, i32, i32
  }
}

</mosaic_0001>

<bundles_post_ra>
// kernel: tri_loss.1
= control target key start
LH: loop header
LB: loop body
LE: loop exit
PB: predicated region body
PF: predicated region fallthrough
CT: control target
= control target key end

     0   :  { %s653_s15 = smov 0   ;;  %s655_s16 = smov 0   ;;  %s719_s0 = inlined_call_operand.vmem [shape: f32[2,2,128], index: 0, kind: input, shape index: {}]   ;;  %s720_s1 = inlined_call_operand.vmem [shape: s32[2,2,128], index: 1, kind: input, shape index: {}]   ;;  %s721_s2 = inlined_call_operand.vmem [shape: f32[2,2,2,128], index: 2, kind: input, shape index: {}]   ;;  %s722_s3 = inlined_call_operand.vmem [shape: f32[2,2,2,128], index: 3, kind: input, shape index: {}]   ;;  %s723_s4 = inlined_call_operand.vmem [shape: f32[2,4,128], index: 4, kind: output, shape index: {}]  }
   0x1   :  { %s657_s17 = smov 0  }
   0x2 LB: > { %s26_s18 = sadd.s32 1, %s619_s16  ;;  %p551_p0 = scmp.ge.s32.totalorder %s623_s17, 1  ;;  %s623_s17 = sphi %s657_s17, %s14_s17   ;;  %s619_s16 = sphi %s655_s16, %s725_s16   ;;  %s615_s15 = sphi %s653_s15, %s724_s15  }
   0x3   : > { %p28_p1 = scmp.ge.s32.totalorder %s26_s18, 2  ;;  %p222_p2 = scmp.lt.s32.totalorder %s623_s17, 3 }
   0x5   : > { %s727_s18 = smov (%p28_p1, %s26_s18), 0  ;;  %p223_p3 = pnand %p551_p0, %p222_p2 }
   0x6   : > { %p272_p4 = scmp.lt.s32.totalorder (!%p223_p3), %s615_s15, 1  ;;  %v625_v0 = vmov (!%p223_p3), 0.0   ;;  %v626_v48 = vmov (!%p223_p3), 0.01   ;;  %vm391_vm3 = vcmask (!%p223_p3), 1041408   ;;  %v627_v55 = vmov (!%p223_p3), 1.0  }
   0x7   : > { %226 = sbr.rel (%p223_p3) target bundleno = 86 (0x56), region = 36  ;;  %310 = vst [vmem:[#allocation2] sm:$0x3] (!%p223_p3), %v625_v0  ;;  %311 = vst [vmem:[#allocation2 + $0x2] sm:$0x3] (!%p223_p3), %v625_v0  ;;  %vm424_vm4 = vcmask (!%p223_p3), 1041409  }
   0x8   : > { %312 = vst [vmem:[#allocation2 + $0x4] sm:$0x3] (!%p223_p3), %v625_v0  ;;  %313 = vst [vmem:[#allocation2 + $0x6] sm:$0x3] (!%p223_p3), %v625_v0  ;;  %vm426_vm5 = vcmask (!%p223_p3), 1042434   ;;  %vm428_vm6 = vcmask (!%p223_p3), 1043459  }
   0xe   : > { %s729_s15 = smov (!%p272_p4, %s615_s15), 1  ;;  %v369_v23 = vld [vmem:[#allocation2] sm:$0x3]  ;;  %v373_v53 = vld [vmem:[#allocation2 + $0x2] sm:$0x3] }
   0xf   : > { %s552_s19 = sshll.u32 %s729_s15, 1  ;;  %s671_s20 = sshll.u32 %s729_s15, 2  ;;  %v381_v7 = vld [vmem:[#allocation2 + $0x6] sm:$0x3]  ;;  %v377_v61 = vld [vmem:[#allocation2 + $0x4] sm:$0x3] }
  0x10   : > { %s278_s23 = scalar_lea.vmem %s719_s0, %s552_s19  ;;  %s285_s26 = scalar_lea.vmem %s720_s1, %s552_s19 }
  0x11   : > { %v314_v1 = vld [vmem:[%s278_s23] sm:$0x3]  ;;  %s301_s29 = scalar_lea.vmem %s722_s3, %s671_s20  ;;  %s293_s6 = scalar_lea.vmem %s721_s2, %s671_s20 }
  0x12   : > { %v679_v2 = vld [vmem:[%s285_s26] sm:$0x3]  ;;  %v319_v3 = vsub.f32 1.0, %v314_v1  ;;  %v326_v5 = vld [vmem:[%s301_s29 + $0x2] sm:$0x3]  ;;  %s305_s9 = scalar_lea.vmem %s723_s4, %s671_s20 }
  0x13   : > { %vm316_vm0 = vcmp.gt.s32.totalorder %v679_v2, 0  ;;  %v325_v4 = vld [vmem:[%s301_s29] sm:$0x3]  ;;  %v348_v12 = vld [vmem:[%s293_s6 + $0x2] sm:$0x3] }
  0x14   : > { %v559_v6 = vsel %vm316_vm0, 1.0, %v625_v0  ;;  %v327_v8 = vsub.f32 %v326_v5, %v325_v4  ;;  %v320_v9 = vsel %vm316_vm0, %v314_v1, %v319_v3  ;;  %v347_v11 = vld [vmem:[%s293_s6] sm:$0x3]  ;;  %v345_v49 = vsel %vm316_vm0, 1.0, %v626_v48 }
  0x15   : > { %v382_v10 = vadd.f32 %v559_v6, %v381_v7  ;;  %591 = vlog2.f32 %v320_v9  ;;  %v349_v14 = vsub.f32 %v348_v12, %v347_v11  ;;  %v367_v56 = vsel %vm316_vm0, 0.01, %v627_v55 }
  0x16   : > { %v331_v13 = vand.u32 2147483647, %v327_v8  ;;  %v328_v31 = vsub.f32 0.0, %v327_v8 }
  0x17   : > { %383 = vst [vmem:[#allocation2 + $0x6] sm:$0x3] %v382_v10  ;;  %v353_v16 = vand.u32 2147483647, %v349_v14  ;;  %v350_v34 = vsub.f32 0.0, %v349_v14 }
  0x18   : > { %v332_v15 = vsub.f32 0.0, %v331_v13  ;;  %v329_v36 = vsel %vm316_vm0, %v328_v31, %v327_v8 }
  0x19   : > { %v354_v18 = vsub.f32 0.0, %v353_v16  ;;  %v351_v40 = vsel %vm316_vm0, %v350_v34, %v349_v14  ;;  %v330_v42 = vmax.f32 %v329_v36, 0.0 }
  0x1a   : > { %v333_v17 = vmul.f32 1.442695, %v332_v15  ;;  %v352_v46 = vmax.f32 %v351_v40, 0.0 }
  0x1b   : > { %v355_v19 = vmul.f32 1.442695, %v354_v18 }
  0x1c   : > { %593 = vpow2.f32 %v333_v17 }
  0x1d   : > { %595 = vpow2.f32 %v355_v19 }
  0x1e   : > { %v390_v59 = vld [vmem:[#allocation2 + $0x6] sm:$0x3] }
  0x1f   : > { %v592_v20 = vpop.eup %591  ;;  %v413_v1 = vsel %vm391_vm3, %v390_v59, 0.0 }
  0x20   : > { %v322_v21 = vmul.f32 0.6931472, %v592_v20  ;;  %v414_v4 = vrot.slane %v413_v1, 4 }
  0x22   : > { %v323_v22 = vmax.f32 %v322_v21, -100.0  ;;  %v415_v6 = vadd.f32 %v414_v4, %v413_v1 }
  0x24   : > { %v324_v24 = vsub.f32 0.0, %v323_v22  ;;  %v416_v12 = vrot.slane %v415_v6, 2 }
  0x26   : > { %v594_v25 = vpop.eup %593  ;;  %v370_v26 = vadd.f32 %v369_v23, %v324_v24  ;;  %v417_v18 = vadd.f32 %v416_v12, %v415_v6 }
  0x27   : > { %v335_v27 = vadd.f32 1.0, %v594_v25  ;;  %v596_v28 = vpop.eup %595  ;;  %v338_v30 = vmul.f32 -0.5, %v594_v25  ;;  %v341_v35 = vand.u32 2147483647, %v594_v25 }
  0x28   : > { %371 = vst [vmem:[#allocation2] sm:$0x3] %v370_v26  ;;  %v357_v29 = vadd.f32 1.0, %v596_v28  ;;  %v360_v32 = vmul.f32 -0.5, %v596_v28  ;;  %v363_v38 = vand.u32 2147483647, %v596_v28 }
  0x29   : > { %597 = vlog2.f32 %v335_v27  ;;  %v339_v33 = vadd.f32 1.0, %v338_v30  ;;  %vm342_vm1 = vcmp.lt.f32.partialorder %v341_v35, 0.0004427343  ;;  %v418_v24 = vrot.slane %v417_v18, 1 }
  0x2a   : > { %599 = vlog2.f32 %v357_v29  ;;  %v361_v37 = vadd.f32 1.0, %v360_v32  ;;  %vm364_vm2 = vcmp.lt.f32.partialorder %v363_v38, 0.0004427343 }
  0x2b   : > { %v340_v39 = vmul.f32 %v594_v25, %v339_v33  ;;  %v419_v30 = vadd.f32 %v418_v24, %v417_v18 }
  0x2c   : > { %v362_v44 = vmul.f32 %v596_v28, %v361_v37 }
  0x2f   : > { %v387_v51 = vld [vmem:[#allocation2] sm:$0x3] }
  0x30   : > { %v392_v60 = vsel %vm391_vm3, %v387_v51, 0.0 }
  0x31   : > { %v393_v0 = vrot.slane %v392_v60, 4 }
  0x33   : > { %v598_v41 = vpop.eup %597  ;;  %v394_v5 = vadd.f32 %v393_v0, %v392_v60 }
  0x34   : > { %v337_v43 = vmul.f32 0.6931472, %v598_v41  ;;  %v600_v45 = vpop.eup %599 }
  0x35   : > { %v359_v50 = vmul.f32 0.6931472, %v600_v45  ;;  %v395_v2 = vrot.slane %v394_v5, 2 }
  0x36   : > { %v343_v47 = vsel %vm342_vm1, %v340_v39, %v337_v43 }
  0x37   : > { %v344_v52 = vadd.f32 %v343_v47, %v330_v42  ;;  %v365_v54 = vsel %vm364_vm2, %v362_v44, %v359_v50  ;;  %v396_v13 = vadd.f32 %v395_v2, %v394_v5 }
  0x38   : > { %v366_v58 = vadd.f32 %v365_v54, %v352_v46 }
  0x39   : > { %v346_v57 = vmul.f32 %v345_v49, %v344_v52  ;;  %v397_v19 = vrot.slane %v396_v13, 1 }
  0x3a   : > { %v368_v63 = vmul.f32 %v367_v56, %v366_v58 }
  0x3b   : > { %v374_v62 = vadd.f32 %v373_v53, %v346_v57  ;;  %v398_v25 = vadd.f32 %v397_v19, %v396_v13 }
  0x3c   : > { %v378_v3 = vadd.f32 %v377_v61, %v368_v63 }
  0x3d   : > { %375 = vst [vmem:[#allocation2 + $0x2] sm:$0x3] %v374_v62 }
  0x3e   : > { %379 = vst [vmem:[#allocation2 + $0x4] sm:$0x3] %v378_v3 }
  0x44   : > { %v388_v7 = vld [vmem:[#allocation2 + $0x2] sm:$0x3] }
  0x45   : > { %v399_v8 = vsel %vm391_vm3, %v388_v7, 0.0  ;;  %v389_v9 = vld [vmem:[#allocation2 + $0x4] sm:$0x3] }
  0x46   : > { %v400_v10 = vrot.slane %v399_v8, 4  ;;  %v406_v11 = vsel %vm391_vm3, %v389_v9, 0.0 }
  0x47   : > { %v407_v15 = vrot.slane %v406_v11, 4 }
  0x48   : > { %v401_v14 = vadd.f32 %v400_v10, %v399_v8 }
  0x49   : > { %v408_v17 = vadd.f32 %v407_v15, %v406_v11 }
  0x4a   : > { %v402_v16 = vrot.slane %v401_v14, 2 }
  0x4b   : > { %v409_v21 = vrot.slane %v408_v17, 2 }
  0x4c   : > { %v403_v20 = vadd.f32 %v402_v16, %v401_v14 }
  0x4d   : > { %v410_v23 = vadd.f32 %v409_v21, %v408_v17 }
  0x4e   : > { %v404_v22 = vrot.slane %v403_v20, 1 }
  0x4f   : > { %v411_v27 = vrot.slane %v410_v23, 1 }
  0x50   : > { %v405_v26 = vadd.f32 %v404_v22, %v403_v20 }
  0x51   : > { %v412_v28 = vadd.f32 %v411_v27, %v410_v23 }
  0x52   : > { %v425_v29 = vsel %vm424_vm4, %v405_v26, %v398_v25 }
  0x53   : > { %v427_v31 = vsel %vm426_vm5, %v412_v28, %v425_v29 }
  0x54   : > { %v429_v32 = vsel %vm428_vm6, %v419_v30, %v427_v31 }
  0x55   : > { %431 = vst [vmem:[%s305_s9] sm:$0xf] %v429_v32 }
  0x56 PF: > { %s14_s17 = sadd.s32 1, %s623_s17   ;;  %s724_s15 = smov %s619_s16 }
  0x57   : > { %p11_p5 = scmp.ge.s32.totalorder %s14_s17, 4   ;;  %s725_s16 = smov %s727_s18 }
  0x59   :  { %13 = sbr.rel (!%p11_p5) target bundleno = 2 (0x2), region = 86 }

</bundles_post_ra>
